<compile_context>
chip_gen: v6e
topology: v6e:2x2x1
jax: 0.10.0
libtpu: 0.0.40
codegen_flags: <defaults>
</compile_context>

<pallas_src>
import functools

import numpy as np
import jax
import jax.numpy as jnp
from jax.experimental import pallas as pl
from jax.experimental.pallas import tpu as pltpu


def _round_up(x, m):
    return (x + m - 1) // m * m


# ------------------------- Pallas kernel (hot path) -------------------------

def _fusion_conv_kernel(x_ref, fac_ref, w3_ref, b3_ref, w1_ref, b1_ref, o_ref, *, wp):
    """Fused: x*(1+att) -> relu -> conv3x3(same)+b3 -> relu -> conv1x1+b1, one image/step.

    Lane-dense layout: channels (Cp, multiple of 8) on sublanes, flattened zero-padded
    spatial (L = round_up((H+2)*(W+2), 128)) on lanes.  3x3 taps = lane rolls of the
    flattened activation (the zero pad ring supplies out-of-image zeros, so no masks and
    no slice+reshape relayouts).  conv3x3 = 3 accumulating K=3*Cp MXU matmuls.

    x_ref   : (1, Cp, L)     padded feature map, flattened padded spatial on lanes
    fac_ref : (1, L)         multiplicative ROI-attention factor (same flattened layout)
    w3_ref  : (3, Cp, 3*Cp)  w3_ref[kh, co, kw*Cp + ci] = torch_w3[co, ci, kh, kw]
    b3_ref  : (Cp, 1)
    w1_ref  : (Cp, Cp)       1x1 weights, (cout, cin)
    b1_ref  : (Cp, 1)
    o_ref   : (1, Cp, L)     lane-dense output on the same flattened padded grid
    """
    L = x_ref.shape[2]

    # ROI attention fusion + first F.relu: one full-lane-width VPU pass, one broadcast.
    a = jnp.maximum(x_ref[0] * fac_ref[...], 0.0)                      # (Cp, L)

    # conv3x3 "same": tap (kh, kw) of output position q is a[:, q + kh*Wp + kw] in the
    # flattened padded grid -> a static lane roll.  Pack the 3 kw-taps of each row group
    # into a sublane-aligned (3*Cp, L) slab and accumulate one K=3*Cp matmul per kh.
    h3 = b3_ref[...]                                                   # (Cp, 1) -> bcast
    for kh in range(3):
        taps = []
        for kw in range(3):
            s = kh * wp + kw                                           # static offset
            taps.append(a if s == 0 else pltpu.roll(a, shift=(L - s) % L, axis=1))
        slab = jnp.concatenate(taps, axis=0)                           # (3*Cp, L)
        h3 = h3 + jnp.dot(w3_ref[kh], slab, preferred_element_type=jnp.float32)
    h3 = jnp.maximum(h3, 0.0)                                          # F.relu before 1x1

    out = jnp.dot(w1_ref[...], h3, preferred_element_type=jnp.float32) + b1_ref[...]
    o_ref[0] = out.astype(o_ref.dtype)                                 # unmasked vst, L%128==0


def _conv_fusion_pallas(fm_nchw, factor_hw, w3_t, b3, w1_t, b1):
    """Fused attention-multiply + relu + conv3x3 + relu + conv1x1.  NCHW in / NCHW out.

    fm_nchw   : (N, C, H, W)
    factor_hw : (H, W) multiplicative attention factor (prod over boxes of 1+sigmoid)
    w3_t      : (C, C, 3, 3) torch-layout 3x3 weights ;  w1_t : (C, C) torch-layout 1x1
    """
    N, C, H, W = fm_nchw.shape
    Cp = _round_up(C, 8)                    # sublane-aligned channels
    Hp, Wp = H + 2, W + 2                   # zero pad ring for the 3x3 "same" conv
    L = _round_up(Hp * Wp, 128)             # lane-dense flattened padded spatial

    # ---- lane-dense input layout (layout plumbing stays in XLA, outside the kernel) ----
    x = jnp.pad(fm_nchw.astype(jnp.float32),
                ((0, 0), (0, Cp - C), (1, 1), (1, 1)))                     # (N, Cp, Hp, Wp)
    x = jnp.pad(x.reshape(N, Cp, Hp * Wp), ((0, 0), (0, 0), (0, L - Hp * Wp)))

    fac = jnp.pad(factor_hw.astype(jnp.float32), ((1, 1), (1, 1)), constant_values=1.0)
    fac = jnp.pad(fac.reshape(1, Hp * Wp), ((0, 0), (0, L - Hp * Wp)),
                  constant_values=1.0)                                      # (1, L)

    # ---- weights in kernel layout, channel-padded to Cp ----
    w3p = jnp.pad(w3_t.astype(jnp.float32), ((0, Cp - C), (0, Cp - C), (0, 0), (0, 0)))
    w3k = jnp.transpose(w3p, (2, 0, 3, 1)).reshape(3, Cp, 3 * Cp)           # [kh, co, kw*Cp+ci]
    w1k = jnp.pad(w1_t.astype(jnp.float32), ((0, Cp - C), (0, Cp - C)))
    b3k = jnp.pad(b3.astype(jnp.float32), (0, Cp - C)).reshape(Cp, 1)
    b1k = jnp.pad(b1.astype(jnp.float32), (0, Cp - C)).reshape(Cp, 1)

    kernel = functools.partial(_fusion_conv_kernel, wp=Wp)
    out = pl.pallas_call(
        kernel,
        out_shape=jax.ShapeDtypeStruct((N, Cp, L), jnp.float32),
        grid_spec=pltpu.PrefetchScalarGridSpec(
            num_scalar_prefetch=0,
            grid=(N,),                                   # one image per step, independent
            in_specs=[
                pl.BlockSpec((1, Cp, L), lambda n: (n, 0, 0)),
                pl.BlockSpec((1, L), lambda n: (0, 0)),
                pl.BlockSpec((3, Cp, 3 * Cp), lambda n: (0, 0, 0)),
                pl.BlockSpec((Cp, 1), lambda n: (0, 0)),
                pl.BlockSpec((Cp, Cp), lambda n: (0, 0)),
                pl.BlockSpec((Cp, 1), lambda n: (0, 0)),
            ],
            out_specs=pl.BlockSpec((1, Cp, L), lambda n: (n, 0, 0)),
        ),
        compiler_params=pltpu.CompilerParams(
            # Independent per-image steps -> megacore-shard across v7x's 2 TensorCores.
            dimension_semantics=("parallel",),
            # Explicit scoped-VMEM budget with headroom under v7x's 64 MiB physical VMEM
            # (scoped defaults are only 16/32 MiB on v5e / v6e+).
            vmem_limit_bytes=48 * 1024 * 1024,
        ),
    )(x, fac, w3k, b3k, w1k, b1k)

    # Drop channel padding and extract the valid HxW window of the flattened padded grid.
    return out[:, :C, : Hp * Wp].reshape(N, C, Hp, Wp)[:, :, :H, :W]


# ------------------------- host-side glue -------------------------

def _np_bilinear_resize(img, out_h, out_w):
    """2-D bilinear resize matching F.interpolate(mode='bilinear', align_corners=False)."""
    in_h, in_w = img.shape

    def axis(out_size, in_size):
        i = np.arange(out_size, dtype=np.float64)
        src = (i + 0.5) * (in_size / out_size) - 0.5
        src = np.clip(src, 0.0, in_size - 1)
        lo = np.floor(src).astype(np.int64)
        hi = np.minimum(lo + 1, in_size - 1)
        frac = (src - lo).astype(np.float32)
        return lo, hi, frac

    ylo, yhi, yf = axis(out_h, in_h)
    xlo, xhi, xf = axis(out_w, in_w)
    a = img[np.ix_(ylo, xlo)]
    b = img[np.ix_(ylo, xhi)]
    c = img[np.ix_(yhi, xlo)]
    d = img[np.ix_(yhi, xhi)]
    top = a * (1.0 - xf)[None, :] + b * xf[None, :]
    bot = c * (1.0 - xf)[None, :] + d * xf[None, :]
    return top * (1.0 - yf)[:, None] + bot * yf[:, None]


def _compute_attention_factor_host(masks_np, boxes_np, im_h, im_w):
    """prod_i (1 + sigmoid(resized_mask_i)) per pixel.  The reference multiplies the
    feature map in place per box; accumulating the product first is equivalent."""
    factor = np.ones((im_h, im_w), np.float32)
    for i in range(boxes_np.shape[0]):
        x0, y0, x1, y1 = (int(v) for v in boxes_np[i])
        w = max(x1 - x0 + 1, 1)
        h = max(y1 - y0 + 1, 1)
        # NOTE: reproduces the reference module's (w, h) resize-target ordering and its
        # im_w/im_h crop/clip convention exactly (rows clipped vs im_w-y0, cols vs im_h-x0).
        resized = _np_bilinear_resize(masks_np[i, 0].astype(np.float32), w, h)
        rh = max(min(w, im_w - y0), 0)
        rw = max(min(h, im_h - x0), 0)
        if rh <= 0 or rw <= 0:
            continue
        att = 1.0 + 1.0 / (1.0 + np.exp(-resized[:rh, :rw]))
        factor[y0:y0 + rh, x0:x0 + rw] *= att
    return factor


def make_params(num_classes, key):
    """Deterministic init mimicking conv_with_kaiming_uniform (kaiming_uniform a=1, zero
    bias).  Weights are kept in the torch layout; the Pallas wrapper repacks them."""
    C = num_classes
    k3, k1 = jax.random.split(key, 2)

    def kaiming_uniform(k, shape, fan_in, a=1.0):
        gain = (2.0 / (1.0 + a * a)) ** 0.5
        bound = gain * (3.0 / fan_in) ** 0.5
        return jax.random.uniform(k, shape, jnp.float32, -bound, bound)

    w3 = kaiming_uniform(k3, (C, C, 3, 3), fan_in=C * 9)   # torch (cout, cin, kh, kw)
    b3 = jnp.zeros((C,), jnp.float32)
    w1 = kaiming_uniform(k1, (C, C), fan_in=C)             # torch (cout, cin) of the 1x1
    b1 = jnp.zeros((C,), jnp.float32)
    return w3, b3, w1, b1


def roi_feature_fusion_forward(masks, boxes, feature_map, params, attention_fusion=True):
    """JAX/Pallas equivalent of ROIFeatureFusion.forward.

    masks       : (num_rois, 1, Mh, Mw) mask logits (jnp array)
    boxes       : (num_rois, 4) host int array [x0, y0, x1, y1]
    feature_map : (N, C, im_h, im_w) NCHW jnp array
    """
    N, C, im_h, im_w = feature_map.shape
    w3, b3, w1, b1 = params

    masks_np = np.asarray(masks)                    # one small device->host pull
    boxes_np = np.asarray(boxes).astype(np.int32)

    if not attention_fusion:
        # Non-attention branch: pure paste overwrite (no conv stack); sequential order
        # matches the reference for overlapping boxes.
        fm = feature_map
        for i in range(boxes_np.shape[0]):
            x0, y0, x1, y1 = (int(v) for v in boxes_np[i])
            w = max(x1 - x0 + 1, 1)
            h = max(y1 - y0 + 1, 1)
            resized = _np_bilinear_resize(masks_np[i, 0].astype(np.float32), w, h)
            rh = max(min(w, im_w - y0), 0)
            rw = max(min(h, im_h - x0), 0)
            if rh <= 0 or rw <= 0:
                continue
            cropped = jnp.asarray(resized[:rh, :rw], dtype=fm.dtype)
            fm = fm.at[:, :, y0:y0 + rh, x0:x0 + rw].set(
                jnp.broadcast_to(cropped, (N, C, rh, rw)))
        return fm

    # Attention branch: accumulate the multiplicative factor once on host, then run the
    # fused attention-multiply + relu + conv3x3 + relu + conv1x1 Pallas kernel.
    factor = jnp.asarray(_compute_attention_factor_host(masks_np, boxes_np, im_h, im_w))
    return _conv_fusion_pallas(feature_map, factor, w3, b3, w1, b1)


# ------------------------- plain-numpy reference (for the demo check) -------------------------

def _reference_forward_np(fm, factor_hw, w3, b3, w1, b1):
    N, C, H, W = fm.shape
    a = np.maximum(fm * factor_hw[None, None], 0.0)
    apad = np.pad(a, ((0, 0), (0, 0), (1, 1), (1, 1)))
    h3 = np.zeros((N, C, H, W), np.float32)
    for kh in range(3):
        for kw in range(3):
            h3 += np.einsum("oc,nchw->nohw", w3[:, :, kh, kw],
                            apad[:, :, kh:kh + H, kw:kw + W])
    h3 = np.maximum(h3 + b3[None, :, None, None], 0.0)
    return np.einsum("oc,nchw->nohw", w1, h3) + b1[None, :, None, None]


# ------------------------- demo -------------------------

if __name__ == "__main__":
    key = jax.random.PRNGKey(0)
    kf, km, kp = jax.random.split(key, 3)

    num_classes = 8                                    # cfg.MODEL.ROI_BOX_HEAD.NUM_CLASSES
    N, C, im_h, im_w = 2, num_classes, 16, 16

    feature_map = jax.random.normal(kf, (N, C, im_h, im_w), jnp.float32)
    masks = jax.random.normal(km, (3, 1, 7, 7), jnp.float32)       # per-ROI mask logits
    boxes = np.array([[1, 2, 6, 8],
                      [4, 3, 12, 10],
                      [0, 0, 15, 15]], dtype=np.int32)             # [x0, y0, x1, y1]

    params = make_params(num_classes, kp)
    out = roi_feature_fusion_forward(masks, boxes, feature_map, params,
                                     attention_fusion=True)
    out = jax.block_until_ready(out)
    assert out.shape == (N, C, im_h, im_w)

    # Structural correctness check against a plain-numpy forward of the same module.
    factor_np = _compute_attention_factor_host(np.asarray(masks), boxes, im_h, im_w)
    w3n, b3n, w1n, b1n = (np.asarray(p) for p in params)
    ref = _reference_forward_np(np.asarray(feature_map), factor_np, w3n, b3n, w1n, b1n)
    np.testing.assert_allclose(np.asarray(out), ref, rtol=5e-2, atol=5e-2)
    print("KERNEL_OK")
</pallas_src>

<mosaic_0001>
module attributes {stable_mosaic.version = 11 : i64} {
  func.func @_fusion_conv_kernel(%arg0: i32, %arg1: memref<1x8x384xf32, #tpu.memory_space<vmem>>, %arg2: memref<1x384xf32, #tpu.memory_space<vmem>>, %arg3: memref<3x8x24xf32, #tpu.memory_space<vmem>>, %arg4: memref<8x1xf32, #tpu.memory_space<vmem>>, %arg5: memref<8x8xf32, #tpu.memory_space<vmem>>, %arg6: memref<8x1xf32, #tpu.memory_space<vmem>>, %arg7: memref<1x8x384xf32, #tpu.memory_space<vmem>>) attributes {dimension_semantics = [#tpu.dimension_semantics<parallel>], iteration_bounds = array<i64: 2>, scalar_prefetch = 0 : i64, scratch_operands = 0 : i64, tpu.core_type = #tpu.core_type<tc>, window_params = [{transform_indices = @transform_0, window_bounds = array<i64: 1, 8, 384>}, {pipeline_mode = #tpu.pipeline_mode<synchronous>, transform_indices = @transform_1, window_bounds = array<i64: 1, 384>}, {pipeline_mode = #tpu.pipeline_mode<synchronous>, transform_indices = @transform_2, window_bounds = array<i64: 3, 8, 24>}, {pipeline_mode = #tpu.pipeline_mode<synchronous>, transform_indices = @transform_3, window_bounds = array<i64: 8, 1>}, {pipeline_mode = #tpu.pipeline_mode<synchronous>, transform_indices = @transform_4, window_bounds = array<i64: 8, 8>}, {pipeline_mode = #tpu.pipeline_mode<synchronous>, transform_indices = @transform_5, window_bounds = array<i64: 8, 1>}, {transform_indices = @transform_6, window_bounds = array<i64: 1, 8, 384>}]} {
    %c0 = arith.constant 0 : index
    %c0_0 = arith.constant 0 : index
    %c0_1 = arith.constant 0 : index
    %0 = vector.load %arg1[%c0, %c0_0, %c0_1] : memref<1x8x384xf32, #tpu.memory_space<vmem>>, vector<1x8x384xf32>
    %1 = vector.shape_cast %0 : vector<1x8x384xf32> to vector<8x384xf32>
    %c0_2 = arith.constant 0 : index
    %c0_3 = arith.constant 0 : index
    %2 = vector.load %arg2[%c0_2, %c0_3] : memref<1x384xf32, #tpu.memory_space<vmem>>, vector<1x384xf32>
    %3 = vector.broadcast %2 : vector<1x384xf32> to vector<8x384xf32>
    %4 = arith.mulf %1, %3 : vector<8x384xf32>
    %cst = arith.constant 0.000000e+00 : f32
    %5 = vector.broadcast %cst : f32 to vector<8x384xf32>
    %6 = arith.maximumf %4, %5 : vector<8x384xf32>
    %c0_4 = arith.constant 0 : index
    %c0_5 = arith.constant 0 : index
    %7 = vector.load %arg4[%c0_4, %c0_5] : memref<8x1xf32, #tpu.memory_space<vmem>>, vector<8x1xf32>
    %c383_i32 = arith.constant 383 : i32
    %8 = tpu.dynamic_rotate %6 by %c383_i32 dim 1 : vector<8x384xf32>, i32 -> vector<8x384xf32>
    %c382_i32 = arith.constant 382 : i32
    %9 = tpu.dynamic_rotate %6 by %c382_i32 dim 1 : vector<8x384xf32>, i32 -> vector<8x384xf32>
    %10 = tpu.concatenate %6, %8, %9 in 0 : vector<8x384xf32>, vector<8x384xf32>, vector<8x384xf32> -> vector<24x384xf32>
    %c0_6 = arith.constant 0 : index
    %c0_7 = arith.constant 0 : index
    %c0_8 = arith.constant 0 : index
    %11 = vector.load %arg3[%c0_6, %c0_7, %c0_8] : memref<3x8x24xf32, #tpu.memory_space<vmem>>, vector<1x8x24xf32>
    %12 = vector.shape_cast %11 : vector<1x8x24xf32> to vector<8x24xf32>
    %cst_9 = arith.constant dense<0.000000e+00> : vector<8x384xf32>
    %13 = tpu.matmul %12, %10, %cst_9 {dimension_numbers = #tpu.dot_dimension_numbers<[1], [0], [0], [1], [0, 0, 1, 1], [], []>} : vector<8x24xf32>, vector<24x384xf32>, vector<8x384xf32> -> vector<8x384xf32>
    %14 = vector.broadcast %7 : vector<8x1xf32> to vector<8x384xf32>
    %15 = arith.addf %14, %13 : vector<8x384xf32>
    %c366_i32 = arith.constant 366 : i32
    %16 = tpu.dynamic_rotate %6 by %c366_i32 dim 1 : vector<8x384xf32>, i32 -> vector<8x384xf32>
    %c365_i32 = arith.constant 365 : i32
    %17 = tpu.dynamic_rotate %6 by %c365_i32 dim 1 : vector<8x384xf32>, i32 -> vector<8x384xf32>
    %c364_i32 = arith.constant 364 : i32
    %18 = tpu.dynamic_rotate %6 by %c364_i32 dim 1 : vector<8x384xf32>, i32 -> vector<8x384xf32>
    %19 = tpu.concatenate %16, %17, %18 in 0 : vector<8x384xf32>, vector<8x384xf32>, vector<8x384xf32> -> vector<24x384xf32>
    %c1 = arith.constant 1 : index
    %c0_10 = arith.constant 0 : index
    %c0_11 = arith.constant 0 : index
    %20 = vector.load %arg3[%c1, %c0_10, %c0_11] : memref<3x8x24xf32, #tpu.memory_space<vmem>>, vector<1x8x24xf32>
    %21 = vector.shape_cast %20 : vector<1x8x24xf32> to vector<8x24xf32>
    %cst_12 = arith.constant dense<0.000000e+00> : vector<8x384xf32>
    %22 = tpu.matmul %21, %19, %cst_12 {dimension_numbers = #tpu.dot_dimension_numbers<[1], [0], [0], [1], [0, 0, 1, 1], [], []>} : vector<8x24xf32>, vector<24x384xf32>, vector<8x384xf32> -> vector<8x384xf32>
    %23 = arith.addf %15, %22 : vector<8x384xf32>
    %c348_i32 = arith.constant 348 : i32
    %24 = tpu.dynamic_rotate %6 by %c348_i32 dim 1 : vector<8x384xf32>, i32 -> vector<8x384xf32>
    %c347_i32 = arith.constant 347 : i32
    %25 = tpu.dynamic_rotate %6 by %c347_i32 dim 1 : vector<8x384xf32>, i32 -> vector<8x384xf32>
    %c346_i32 = arith.constant 346 : i32
    %26 = tpu.dynamic_rotate %6 by %c346_i32 dim 1 : vector<8x384xf32>, i32 -> vector<8x384xf32>
    %27 = tpu.concatenate %24, %25, %26 in 0 : vector<8x384xf32>, vector<8x384xf32>, vector<8x384xf32> -> vector<24x384xf32>
    %c2 = arith.constant 2 : index
    %c0_13 = arith.constant 0 : index
    %c0_14 = arith.constant 0 : index
    %28 = vector.load %arg3[%c2, %c0_13, %c0_14] : memref<3x8x24xf32, #tpu.memory_space<vmem>>, vector<1x8x24xf32>
    %29 = vector.shape_cast %28 : vector<1x8x24xf32> to vector<8x24xf32>
    %cst_15 = arith.constant dense<0.000000e+00> : vector<8x384xf32>
    %30 = tpu.matmul %29, %27, %cst_15 {dimension_numbers = #tpu.dot_dimension_numbers<[1], [0], [0], [1], [0, 0, 1, 1], [], []>} : vector<8x24xf32>, vector<24x384xf32>, vector<8x384xf32> -> vector<8x384xf32>
    %31 = arith.addf %23, %30 : vector<8x384xf32>
    %cst_16 = arith.constant 0.000000e+00 : f32
    %32 = vector.broadcast %cst_16 : f32 to vector<8x384xf32>
    %33 = arith.maximumf %31, %32 : vector<8x384xf32>
    %c0_17 = arith.constant 0 : index
    %c0_18 = arith.constant 0 : index
    %34 = vector.load %arg5[%c0_17, %c0_18] : memref<8x8xf32, #tpu.memory_space<vmem>>, vector<8x8xf32>
    %cst_19 = arith.constant dense<0.000000e+00> : vector<8x384xf32>
    %35 = tpu.matmul %34, %33, %cst_19 {dimension_numbers = #tpu.dot_dimension_numbers<[1], [0], [0], [1], [0, 0, 1, 1], [], []>} : vector<8x8xf32>, vector<8x384xf32>, vector<8x384xf32> -> vector<8x384xf32>
    %c0_20 = arith.constant 0 : index
    %c0_21 = arith.constant 0 : index
    %36 = vector.load %arg6[%c0_20, %c0_21] : memref<8x1xf32, #tpu.memory_space<vmem>>, vector<8x1xf32>
    %37 = vector.broadcast %36 : vector<8x1xf32> to vector<8x384xf32>
    %38 = arith.addf %35, %37 : vector<8x384xf32>
    %c0_22 = arith.constant 0 : index
    %c0_23 = arith.constant 0 : index
    %c0_24 = arith.constant 0 : index
    %39 = vector.load %arg7[%c0_22, %c0_23, %c0_24] : memref<1x8x384xf32, #tpu.memory_space<vmem>>, vector<1x8x384xf32>
    %40 = vector.shape_cast %39 : vector<1x8x384xf32> to vector<8x384xf32>
    %41 = vector.shape_cast %38 : vector<8x384xf32> to vector<1x8x384xf32>
    tpu.vector_store %arg7[%c0_22, %c0_23, %c0_24], %41 {strides = array<i32>} : memref<1x8x384xf32, #tpu.memory_space<vmem>>, vector<1x8x384xf32>,
    return
  }
  func.func @transform_0(%arg0: i32) -> (i32, i32, i32) {
    %c0_i32 = arith.constant 0 : i32
    %c0_i32_0 = arith.constant 0 : i32
    %c0_i32_1 = arith.constant 0 : i32
    return %arg0, %c0_i32, %c0_i32_0 : i32, i32, i32
  }
  func.func @transform_1(%arg0: i32) -> (i32, i32) {
    %c0_i32 = arith.constant 0 : i32
    %c0_i32_0 = arith.constant 0 : i32
    %c0_i32_1 = arith.constant 0 : i32
    return %c0_i32, %c0_i32_0 : i32, i32
  }
  func.func @transform_2(%arg0: i32) -> (i32, i32, i32) {
    %c0_i32 = arith.constant 0 : i32
    %c0_i32_0 = arith.constant 0 : i32
    %c0_i32_1 = arith.constant 0 : i32
    %c0_i32_2 = arith.constant 0 : i32
    return %c0_i32, %c0_i32_0, %c0_i32_1 : i32, i32, i32
  }
  func.func @transform_3(%arg0: i32) -> (i32, i32) {
    %c0_i32 = arith.constant 0 : i32
    %c0_i32_0 = arith.constant 0 : i32
    %c0_i32_1 = arith.constant 0 : i32
    return %c0_i32, %c0_i32_0 : i32, i32
  }
  func.func @transform_4(%arg0: i32) -> (i32, i32) {
    %c0_i32 = arith.constant 0 : i32
    %c0_i32_0 = arith.constant 0 : i32
    %c0_i32_1 = arith.constant 0 : i32
    return %c0_i32, %c0_i32_0 : i32, i32
  }
  func.func @transform_5(%arg0: i32) -> (i32, i32) {
    %c0_i32 = arith.constant 0 : i32
    %c0_i32_0 = arith.constant 0 : i32
    %c0_i32_1 = arith.constant 0 : i32
    return %c0_i32, %c0_i32_0 : i32, i32
  }
  func.func @transform_6(%arg0: i32) -> (i32, i32, i32) {
    %c0_i32 = arith.constant 0 : i32
    %c0_i32_0 = arith.constant 0 : i32
    %c0_i32_1 = arith.constant 0 : i32
    return %arg0, %c0_i32, %c0_i32_0 : i32, i32, i32
  }
}

</mosaic_0001>

<bundles_post_ra>
// kernel: tpu_custom_call.1
= control target key start
LH: loop header
LB: loop body
LE: loop exit
PB: predicated region body
PF: predicated region fallthrough
CT: control target
= control target key end

     0   :  { %s1659_s0 = inlined_call_operand.hbm [shape: f32[2,8,384], index: 0, kind: input, shape index: {}]   ;;  %s1660_s1 = inlined_call_operand.vmem [shape: f32[1,384], index: 1, kind: input, shape index: {}]   ;;  %s1661_s2 = inlined_call_operand.hbm [shape: f32[3,8,24], index: 2, kind: input, shape index: {}]   ;;  %s1662_s3 = inlined_call_operand.vmem [shape: f32[8,1], index: 3, kind: input, shape index: {}]   ;;  %s1663_s4 = inlined_call_operand.vmem [shape: f32[8,8], index: 4, kind: input, shape index: {}]   ;;  %s1664_s5 = inlined_call_operand.vmem [shape: f32[8,1], index: 5, kind: input, shape index: {}]   ;;  %s1665_s6 = inlined_call_operand.hbm [shape: f32[2,8,384], index: 6, kind: output, shape index: {}]  }
   0x1   :  { %1670 = sst [smem:[#allocation11_spill]] %s1661_s2 }
   0x2   :  { %11 = vsyncpa [#allocation3], 0 }
   0x3   :  { %13 = vsyncpa [#allocation3 + $0x1], 0 }
   0x4   :  { %14 = vsyncpa [#allocation6], 0 }
   0x5   :  { %15 = vsyncpa [#allocation4], 0 }
   0x6   :  { %17 = vsyncpa [#allocation4 + $0x1], 0  ;;  %s1412_s21 = smov 0   ;;  %s1414_s22 = smov 0  }
   0x7   :  { %s1416_s23 = smov 0   ;;  %s1418_s24 = smov 0  }
   0x8 LB: > { %s1433_s25 = sadd.s32 4294967295, %s1359_s24   ;;  %s1097_s26 = sadd.s32 4294967294, %s1359_s24   ;;  %s1359_s24 = sphi %s1418_s24, %s1689_s24   ;;  %s1355_s23 = sphi %s1416_s23, %s1688_s23   ;;  %s1351_s22 = sphi %s1414_s22, %s1687_s22   ;;  %s1347_s21 = sphi %s1412_s21, %s1686_s21  }
   0x9   : > { %p43_p0 = scmp.ne.s32.totalorder %s1351_s22, %s1347_s21  ;;  %p1666_p1 = scmp.eq.s32.totalorder %s1433_s25, 0 }
   0xa   : > { %p178_p3 = scmp.eq.s32.totalorder %s1097_s26, 1  ;;  %p1098_p5 = scmp.ge.s32.totalorder %s1359_s24, 1 }
   0xb   : > { %p1442_p4 = por %p1666_p1, %p43_p0  ;;  %p185_p7 = scmp.lt.s32.totalorder %s1359_s24, 3 }
   0xc   : > { %p1447_p6 = por %p178_p3, %p43_p0  ;;  %s1361_s30 = smov [#allocation5]  }
   0xd   : > { %s1671_s27 = scalar_select %p1442_p4, 1, 0 }
   0xe   : > { %s1672_s28 = scalar_select %p1447_p6, 1, 0 }
   0xf   : > { %p1452_p8 = pnand %p1098_p5, %p185_p7  ;;  %s200_s7 = sshll.u32 %s1361_s30, 4  ;;  %s201_s7 = int_to_ptr.vmem [resolvable:$true] %s200_s7 }
  0x10   : > { %s1466_s9 = sadd.s32 1, %s1359_s24   ;;  %s30_s10 = sadd.s32 1, %s1355_s23 }
  0x11   : > { %s1673_s29 = scalar_select %p1452_p8, 1, 0 }
  0x12   : > { %p1173_p9 = pneg %p1452_p8  ;;  %s27_s11 = ssub.s32 %s1359_s24, %s1466_s9 }
  0x13   : > { %s1248_s12 = scalar_lea.vmem %s201_s7, 384  ;;  %p1256_p5 = scmp.lt.s32.totalorder %s201_s7, %s201_s7 }
  0x14   : > { %p1461_p11 = pnand %p1173_p9, %p1666_p1  ;;  %p1249_p13 = scmp.ne.s32.totalorder %s201_s7, %s1248_s12 }
  0x15   : > { %p1257_p7 = scmp.lt.s32.totalorder %s1248_s12, %s1248_s12 }
  0x16   : > { %p1239_p12 = pneg %p1461_p11 }
  0x17   : > { %p1258_p10 = por %p1257_p7, %p1256_p5 }
  0x18   : > { %p1251_p0 = pnand %p1249_p13, %p1239_p12 }
  0x1a   : > { %p1252_p3 = pneg %p1251_p0 }
  0x1c   : > { %p1259_p2 = pnand %p1258_p10, %p1252_p3 }
  0x1e   : > { %1262 = shalt.err (!%p1259_p2)
}
  0x1f   : > { %s1362_s13 = smov 128   ;;  %s1363_s14 = smov 8  }
  0x20   : > { %s1675_s2 = sld [smem:[#allocation11_spill]]  ;;  %p28_p9 = scmp.eq.s32.totalorder %s27_s11, 0 }
  0x21   : > { %p37_p12 = scmp.ne.s32.totalorder %s1355_s23, %s1351_s22  ;;  %p38_p10 = scmp.eq.s32.totalorder %s1359_s24, 0 }
  0x22   : > { %p1186_p2 = scmp.lt.s32.totalorder %s1359_s24, 2  ;;  %p1676_p0 = scmp.eq.s32.totalorder %s1433_s25, 1 }
  0x23   : > { %s1483_s17 = scalar_select %p28_p9, %s1355_s23, %s30_s10  }
  0x24   : > { %p39_p13 = por %p38_p10, %p37_p12  ;;  %p1487_p3 = por %p1676_p0, %p37_p12 }
  0x25   : > { %s223_s19 = sand.u32 1, %s1355_s23   ;;  %s1162_s20 = smul.u32 384, %s1359_s24 }
  0x26   : > { %1176 = dma.hbm_to_vmem [thread:$0]  (!%p1461_p11), %s1675_s2, 384, %s201_s7, [#allocation6], %s1362_s13, %s1362_s13, %s1363_s14  }
  0x27   : > { %s1677_s18 = scalar_select %p1487_p3, 1, 0 }
  0x28   : > { %s1161_s26 = smul.u32 24, %s223_s19  ;;  %p1493_p5 = pnand %p1186_p2, %p39_p13 }
  0x29   : > { %s1500_s11 = scalar_lea.hbm %s1659_s0, %s1162_s20  ;;  %s224_s13 = scalar_lea.sflag [#allocation3], %s223_s19 }
  0x2a   : > { %s227_s10 = scalar_lea.vmem [#allocation2], %s1161_s26  ;;  %s1263_s14 = scalar_lea.hbm %s1500_s11, 384 }
  0x2b   : > { %s235_s12 = sshll.u32 %s227_s10, 4  ;;  %p1264_p11 = scmp.ne.s32.totalorder %s1500_s11, %s1263_s14  ;;  %s236_s12 = int_to_ptr.vmem [resolvable:$true] %s235_s12 }
  0x2c   : > { %p1265_p7 = pneg %p1493_p5  ;;  %s1268_s7 = scalar_lea.hbm %s1659_s0, 768 }
  0x2d   : > { %p1269_p10 = scmp.lt.s32.totalorder %s1500_s11, %s1659_s0  ;;  %p1270_p2 = scmp.lt.s32.totalorder %s1268_s7, %s1263_s14 }
  0x2e   : > { %p1266_p9 = pnand %p1265_p7, %p1264_p11 }
  0x2f   : > { %p1271_p13 = por %p1270_p2, %p1269_p10 }
  0x30   : > { %p1267_p12 = pneg %p1266_p9 }
  0x32   : > { %p1272_p0 = pnand %p1271_p13, %p1267_p12 }
  0x34   : > { %1275 = shalt.err (!%p1272_p0)
}
  0x35   : > { %s1276_s26 = scalar_lea.vmem %s236_s12, 384  ;;  %s1364_s19 = smov [#allocation2]  }
  0x36   : > { %p1277_p1 = scmp.ne.s32.totalorder %s236_s12, %s1276_s26  ;;  %s1281_s10 = sshll.u32 %s1364_s19, 4  ;;  %s1282_s10 = int_to_ptr.vmem [resolvable:$false] %s1281_s10 }
  0x37   : > { %s1283_s2 = scalar_lea.vmem %s1282_s10, 768  ;;  %p1284_p11 = scmp.lt.s32.totalorder %s236_s12, %s1282_s10 }
  0x38   : > { %p1279_p6 = pnand %p1277_p1, %p1265_p7  ;;  %p1285_p9 = scmp.lt.s32.totalorder %s1283_s2, %s1276_s26 }
  0x3a   : > { %p1280_p3 = pneg %p1279_p6  ;;  %p1286_p4 = por %p1285_p9, %p1284_p11 }
  0x3c   : > { %p1287_p8 = pnand %p1286_p4, %p1280_p3 }
  0x3e   : > { %1290 = shalt.err (!%p1287_p8)
}
  0x3f   : > { %1180 = dma.hbm_to_vmem [thread:$0]  (!%p1493_p5), %s1500_s11, 384, %s236_s12, %s224_s13  }
  0x40   : > { %p1679_p12 = scmp.ne.s32.totalorder %s1673_s29, 0 }
  0x41   : > { %s1519_s14 = sand.u32 (!%p1679_p12), 1, %s1351_s22   ;;  %p1680_p1 = scmp.ne.s32.totalorder (!%p1679_p12), %s1671_s27, 0 }
  0x42   : > { %244 = sbr.rel (%p1679_p12) target bundleno = 660 (0x294), region = 44  ;;  %s247_s16 = scalar_lea.sflag (!%p1679_p12), [#allocation3], %s1519_s14 }
  0x43   : > { %s1163_s15 = smul.u32 (!%p1679_p12), 24, %s1519_s14 }
  0x45   : > { %s250_s2 = scalar_lea.vmem (!%p1679_p12), [#allocation2], %s1163_s15 }
  0x47   : > { %1334 = dma.done.wait (%p1680_p1), %s247_s16, 384  }
  0x48   : > { %1336 = vsyncadd (%p1680_p1), %s247_s16, 4294966912  ;;  %p1681_p4 = scmp.eq.s32.totalorder %s1433_s25, 0 }
  0x4a   : > { %1338 = dma.done.wait (%p1681_p4), [#allocation6], 384   ;;  %p1682_p6 = pmov %p1681_p4 }
  0x4b   : > { %v288_v0 = vlaneseq  ;;  %v1365_v5 = vmov 0.0   ;;  %v284_v6 = vld [vmem:[%s250_s2 + $0x8] sm:$0xff]  ;;  %v283_v8 = vld [vmem:[%s250_s2] sm:$0xff]  ;;  %v285_v11 = vld [vmem:[%s250_s2 + $0x10] sm:$0xff]  ;;  %s1366_s30 = smov 126   ;;  %vm1367_vm0 = vmmov 0  }
  0x4c   : > { %1340 = vsyncadd (%p1682_p6), [#allocation6], 4294966912  ;;  %1129 = vmatprep.subr.mxu1 %v1365_v5  ;;  %401 = vmatprep.mubr.f32.mxu0 %v1365_v5  ;;  %v286_v7 = vld [vmem:[%s1660_s1] sm:$0x7]  ;;  %s1368_s11 = smov 127   ;;  %s1369_s12 = smov 108  }
  0x4d   : > { %v289_v1 = vshrl.u32 %v288_v0, 7  ;;  %1135 = vmatprep.mubr.msk.f32.mxu1 %vm1367_vm0, %v1365_v5  ;;  %s1370_s13 = smov 109   ;;  %s1371_s7 = smov 110   ;;  %v1373_v19 = vmov 0   ;;  %v309_v20 = vld [vmem:[%s1662_s3] sm:$0xff]  ;;  %v1573_v21 = vand.u32 127, %v288_v0 }
  0x4e   : > { %s1372_s8 = smov 90   ;;  %1235 = vset.pattern.permute.xlu0 %v1373_v19  ;;  %1236 = vset.pattern.permute.xlu1 %v1373_v19  ;;  %s1374_s20 = smov 91   ;;  %v332_v34 = vld [vmem:[#allocation5] sm:$0xff]  ;;  %vm333_vm4 = vcmask 195584   ;;  %v517_v52 = vld [vmem:[#allocation5 + $0x8] sm:$0xff]  ;;  %vm854_vm10 = vcmask 64512  }
  0x4f   : > { %v294_v2 = vsub.s32 1, %v289_v1  ;;  %v290_v3 = vsub.s32 0, %v289_v1  ;;  %v298_v4 = vsub.s32 2, %v289_v1  ;;  %s1375_s26 = smov 92   ;;  %vm328_vm1 = vcmp.lt.s32.totalorder %v1573_v21, 126  ;;  %p1683_p3 = scmp.ne.s32.totalorder %s1677_s18, 0 }
  0x50   : > { %vm318_vm2 = vcmp.lt.s32.totalorder %v1573_v21, 127  ;;  %vm512_vm3 = vcmp.lt.s32.totalorder %v1573_v21, 108  ;;  %vm502_vm5 = vcmp.lt.s32.totalorder %v1573_v21, 109  ;;  %vm492_vm6 = vcmp.lt.s32.totalorder %v1573_v21, 110 }
  0x51   : > { %v295_v9 = vrot.slane %v286_v7, %v294_v2  ;;  %v291_v10 = vrot.slane %v286_v7, %v290_v3  ;;  %v299_v12 = vrot.slane %v286_v7, %v298_v4  ;;  %vm691_vm7 = vcmp.lt.s32.totalorder %v1573_v21, 90 }
  0x52   : > { %vm681_vm8 = vcmp.lt.s32.totalorder %v1573_v21, 91  ;;  %vm671_vm9 = vcmp.lt.s32.totalorder %v1573_v21, 92 }
  0x53   : > { %v304_v13 = vmul.f32 %v295_v9, %v284_v6  ;;  %v303_v14 = vmul.f32 %v291_v10, %v283_v8  ;;  %v305_v15 = vmul.f32 %v299_v12, %v285_v11  ;;  %v696_v6 = vld [vmem:[#allocation5 + $0x10] sm:$0xff] }
  0x54   : > { %v848_v10 = vld [vmem:[%s1664_s5] sm:$0xff] }
  0x55   : > { %v1538_v16 = vmax.f32 %v304_v13, 0.0  ;;  %v1540_v17 = vmax.f32 %v303_v14, 0.0  ;;  %v1544_v18 = vmax.f32 %v305_v15, 0.0 }
  0x57   : > { %324 = vrot.lane.b32.xlu0 %v1538_v16, %s1366_s30  ;;  %322 = vrot.lane.b32.xlu1 %v1540_v17, %s1366_s30 }
  0x5b   : > { %326 = vrot.lane.b32.xlu0 %v1544_v18, %s1366_s30  ;;  %312 = vrot.lane.b32.xlu1 %v1538_v16, %s1368_s11  ;;  %s282_s30 = scalar_lea.vmem [#allocation7], %s1163_s15  ;;  %s1376_s15 = smov [#allocation7]  }
  0x5f   : > { %314 = vrot.lane.b32.xlu0 %v1544_v18, %s1368_s11  ;;  %310 = vrot.lane.b32.xlu1 %v1540_v17, %s1368_s11  ;;  %s1164_s11 = smul.u32 384, %s1433_s25  ;;  %s1295_s25 = sshll.u32 %s1376_s15, 4  ;;  %s1296_s25 = int_to_ptr.vmem [resolvable:$false] %s1295_s25 }
  0x60   : > { %s1297_s19 = scalar_lea.vmem %s1296_s25, 768 }
  0x63   : > { %508 = vrot.lane.b32.xlu0 %v1538_v16, %s1369_s12  ;;  %510 = vrot.lane.b32.xlu1 %v1544_v18, %s1369_s12 }
  0x67   : > { %506 = vrot.lane.b32.xlu0 %v1540_v17, %s1369_s12  ;;  %498 = vrot.lane.b32.xlu1 %v1538_v16, %s1370_s13  ;;  %s1017_s12 = sshll.u32 %s282_s30, 4  ;;  %s1018_s12 = int_to_ptr.vmem [resolvable:$true] %s1017_s12 }
  0x68   : > { %p1298_p10 = scmp.lt.s32.totalorder %s1018_s12, %s1296_s25 }
  0x6b   : > { %500 = vrot.lane.b32.xlu0 %v1544_v18, %s1370_s13  ;;  %496 = vrot.lane.b32.xlu1 %v1540_v17, %s1370_s13 }
  0x6f   : > { %488 = vrot.lane.b32.xlu0 %v1538_v16, %s1371_s7  ;;  %490 = vrot.lane.b32.xlu1 %v1544_v18, %s1371_s7 }
  0x73   : > { %486 = vrot.lane.b32.xlu0 %v1540_v17, %s1371_s7  ;;  %687 = vrot.lane.b32.xlu1 %v1538_v16, %s1372_s8 }
  0x77   : > { %689 = vrot.lane.b32.xlu0 %v1544_v18, %s1372_s8  ;;  %685 = vrot.lane.b32.xlu1 %v1540_v17, %s1372_s8  ;;  %s1015_s8 = scalar_lea.hbm %s1665_s6, %s1164_s11 }
  0x7b   : > { %677 = vrot.lane.b32.xlu0 %v1538_v16, %s1374_s20  ;;  %679 = vrot.lane.b32.xlu1 %v1544_v18, %s1374_s20 }
  0x7f   : > { %675 = vrot.lane.b32.xlu0 %v1540_v17, %s1374_s20  ;;  %667 = vrot.lane.b32.xlu1 %v1538_v16, %s1375_s26  ;;  %s1003_s20 = scalar_lea.sflag [#allocation4], %s1519_s14 }
  0x83   : > { %669 = vrot.lane.b32.xlu0 %v1544_v18, %s1375_s26  ;;  %665 = vrot.lane.b32.xlu1 %v1540_v17, %s1375_s26  ;;  %s1291_s26 = scalar_lea.vmem %s1018_s12, 384 }
  0x84   : > { %p1292_p8 = scmp.ne.s32.totalorder %s1018_s12, %s1291_s26  ;;  %p1299_p2 = scmp.lt.s32.totalorder %s1297_s19, %s1291_s26 }
  0x86   : > { %p1293_p5 = pnand %p1292_p8, %p1683_p3  ;;  %p1300_p13 = por %p1299_p2, %p1298_p10 }
  0x87   : > { %480 = vperm.xlu0 %1235, %v309_v20   ;;  %851 = vperm.xlu1 %1236, %v848_v10  }
  0x88   : > { %p1294_p7 = pneg %p1293_p5 }
  0x8a   : > { %p1301_p0 = pnand %p1300_p13, %p1294_p7 }
  0xc9   : > { %v325_v22 = vpop.permute.xlu0 %324  ;;  %v323_v23 = vpop.permute.xlu1 %322 }
  0xca   : > { %v330_v28 = vsel %vm328_vm1, %v323_v23, %v325_v22 }
  0xcd   : > { %v327_v24 = vpop.permute.xlu0 %326  ;;  %v313_v25 = vpop.permute.xlu1 %312 }
  0xce   : > { %v329_v26 = vsel %vm328_vm1, %v325_v22, %v327_v24  ;;  %v331_v27 = vsel %vm328_vm1, %v327_v24, %v323_v23 }
  0xcf   : > { %363 = vmatprep.subr.mxu0 %v329_v26  ;;  %1130 = vmatpush3.msra.mxu1 %v331_v27 }
  0xd0   : > { %364 = vmatpush1.msra.mxu0 %v330_v28  ;;  %1131 = vmatprep.subr.mxu1 %v1365_v5 }
  0xd1   : > { %v315_v29 = vpop.permute.xlu0 %314  ;;  %v311_v30 = vpop.permute.xlu1 %310 }
  0xd2   : > { %v319_v31 = vsel %vm318_vm2, %v313_v25, %v315_v29  ;;  %v321_v32 = vsel %vm318_vm2, %v315_v29, %v311_v30  ;;  %v320_v33 = vsel %vm318_vm2, %v311_v30, %v313_v25 }
  0xd3   : > { %365 = vmatprep.subr.mxu0 %v319_v31  ;;  %1132 = vmatpush3.msra.mxu1 %v321_v32  ;;  %v847_v32 = vld [vmem:[%s1663_s4] sm:$0xff] }
  0xd4   : > { %366 = vmatpush1.msra.mxu0 %v320_v33  ;;  %1133 = vmatprep.subr.mxu1 %v1365_v5 }
  0xd5   : > { %v509_v35 = vpop.permute.xlu0 %508  ;;  %367 = vmatprep.subr.mxu0 %v1538_v16  ;;  %v511_v36 = vpop.permute.xlu1 %510  ;;  %1134 = vmatpush3.msra.mxu1 %v1544_v18 }
  0xd6   : > { %368 = vmatpush1.msra.mxu0 %v1540_v17  ;;  %v513_v37 = vsel %vm512_vm3, %v509_v35, %v511_v36  ;;  %1138 = vmatprep.subr.mxu1 %v1365_v5 }
  0xd7   : > { %547 = vmatprep.subr.mxu0 %v513_v37  ;;  %1104 = vmatmul.mubr.msk.f32.vlgmr.msra.gmra.mxu0 %vm333_vm4, %v332_v34 }
  0xd8   : > { %1136 = vmatmul.mubr.msk.f32.vlgmr.msra.gmra.mxu1 %vm333_vm4, %v332_v34  ;;  %585 = vmatprep.mubr.f32.mxu0 %v1365_v5 }
  0xd9   : > { %v507_v38 = vpop.permute.xlu0 %506  ;;  %v499_v39 = vpop.permute.xlu1 %498  ;;  %1144 = vmatprep.mubr.msk.f32.mxu1 %vm1367_vm0, %v1365_v5 }
  0xda   : > { %v514_v40 = vsel %vm512_vm3, %v507_v38, %v509_v35  ;;  %v515_v41 = vsel %vm512_vm3, %v511_v36, %v507_v38 }
  0xdb   : > { %548 = vmatpush1.msra.mxu0 %v514_v40  ;;  %1139 = vmatpush3.msra.mxu1 %v515_v41 }
  0xdc   : > { %1140 = vmatprep.subr.mxu1 %v1365_v5 }
  0xdd   : > { %v501_v42 = vpop.permute.xlu0 %500  ;;  %v497_v43 = vpop.permute.xlu1 %496 }
  0xde   : > { %v504_v44 = vsel %vm502_vm5, %v497_v43, %v499_v39  ;;  %v505_v45 = vsel %vm502_vm5, %v501_v42, %v497_v43  ;;  %v503_v46 = vsel %vm502_vm5, %v499_v39, %v501_v42 }
  0xdf   : > { %549 = vmatprep.subr.mxu0 %v503_v46  ;;  %1141 = vmatpush3.msra.mxu1 %v505_v45 }
  0xe0   : > { %550 = vmatpush1.msra.mxu0 %v504_v44  ;;  %1142 = vmatprep.subr.mxu1 %v1365_v5 }
  0xe1   : > { %v489_v47 = vpop.permute.xlu0 %488  ;;  %v491_v48 = vpop.permute.xlu1 %490 }
  0xe2   : > { %v493_v49 = vsel %vm492_vm6, %v489_v47, %v491_v48 }
  0xe3   : > { %551 = vmatprep.subr.mxu0 %v493_v49 }
  0xe5   : > { %v487_v50 = vpop.permute.xlu0 %486  ;;  %v688_v51 = vpop.permute.xlu1 %687 }
  0xe6   : > { %v494_v53 = vsel %vm492_vm6, %v487_v50, %v489_v47  ;;  %v495_v54 = vsel %vm492_vm6, %v491_v48, %v487_v50 }
  0xe7   : > { %552 = vmatpush1.msra.mxu0 %v494_v53  ;;  %1143 = vmatpush3.msra.mxu1 %v495_v54 }
  0xe8   : > { %1147 = vmatprep.subr.mxu1 %v1365_v5  ;;  %1145 = vmatmul.mubr.msk.f32.vlgmr.msra.gmra.mxu1 %vm333_vm4, %v517_v52 }
  0xe9   : > { %v690_v55 = vpop.permute.xlu0 %689  ;;  %v686_v56 = vpop.permute.xlu1 %685  ;;  %1106 = vmatmul.mubr.msk.f32.vlgmr.msra.gmra.mxu0 %vm333_vm4, %v517_v52  ;;  %1153 = vmatprep.mubr.msk.f32.mxu1 %vm1367_vm0, %v1365_v5 }
  0xea   : > { %v693_v57 = vsel %vm691_vm7, %v686_v56, %v688_v51  ;;  %v694_v58 = vsel %vm691_vm7, %v690_v55, %v686_v56  ;;  %v692_v59 = vsel %vm691_vm7, %v688_v51, %v690_v55  ;;  %764 = vmatprep.mubr.f32.mxu0 %v1365_v5 }
  0xeb   : > { %726 = vmatprep.subr.mxu0 %v692_v59  ;;  %1148 = vmatpush3.msra.mxu1 %v694_v58 }
  0xec   : > { %727 = vmatpush1.msra.mxu0 %v693_v57  ;;  %1149 = vmatprep.subr.mxu1 %v1365_v5 }
  0xed   : > { %v678_v60 = vpop.permute.xlu0 %677  ;;  %v680_v61 = vpop.permute.xlu1 %679 }
  0xee   : > { %v682_v62 = vsel %vm681_vm8, %v678_v60, %v680_v61 }
  0xef   : > { %728 = vmatprep.subr.mxu0 %v682_v62 }
  0xf1   : > { %v676_v63 = vpop.permute.xlu0 %675  ;;  %v668_v0 = vpop.permute.xlu1 %667 }
  0xf2   : > { %v683_v1 = vsel %vm681_vm8, %v676_v63, %v678_v60  ;;  %v684_v2 = vsel %vm681_vm8, %v680_v61, %v676_v63 }
  0xf3   : > { %729 = vmatpush1.msra.mxu0 %v683_v1  ;;  %1150 = vmatpush3.msra.mxu1 %v684_v2 }
  0xf4   : > { %1151 = vmatprep.subr.mxu1 %v1365_v5 }
  0xf5   : > { %v670_v3 = vpop.permute.xlu0 %669  ;;  %v666_v4 = vpop.permute.xlu1 %665 }
  0xf6   : > { %v673_v7 = vsel %vm671_vm9, %v666_v4, %v668_v0  ;;  %v674_v8 = vsel %vm671_vm9, %v670_v3, %v666_v4  ;;  %v672_v9 = vsel %vm671_vm9, %v668_v0, %v670_v3 }
  0xf7   : > { %730 = vmatprep.subr.mxu0 %v672_v9  ;;  %1152 = vmatpush3.msra.mxu1 %v674_v8 }
  0xf8   : > { %731 = vmatpush1.msra.mxu0 %v673_v7  ;;  %1154 = vmatmul.mubr.msk.f32.vlgmr.msra.gmra.mxu1 %vm333_vm4, %v696_v6 }
  0xf9   : > { %1108 = vmatmul.mubr.msk.f32.vlgmr.msra.gmra.mxu0 %vm333_vm4, %v696_v6  ;;  %1156 = vmatprep.subr.mxu1 %v1365_v5 }
  0xfa   : > { %922 = vmatprep.mubr.f32.mxu0 %v1365_v5  ;;  %1158 = vmatprep.mubr.msk.f32.mxu1 %vm1367_vm0, %v1365_v5 }
 0x102   : > { %v481_v17 = vpop.permute.xlu0 %480  ;;  %v852_v37 = vpop.permute.xlu1 %851 }
 0x197   : > { %v403_v15 = vpop.f32.mrf.mxu0 }
 0x198   : > { %v474_v11 = vpop.f32.mrf.mxu1  ;;  %v483_v20 = vadd.f32 %v481_v17, %v403_v15 }
 0x199   : > { %v405_v16 = vpop.f32.mrf.mxu0  ;;  %v485_v18 = vadd.f32 %v481_v17, %v474_v11 }
 0x19a   : > { %v1137_v12 = vpop.f32.mrf.mxu1  ;;  %v484_v22 = vadd.f32 %v481_v17, %v405_v16 }
 0x1a8   : > { %v658_v13 = vpop.f32.mrf.mxu1 }
 0x1a9   : > { %v587_v19 = vpop.f32.mrf.mxu0  ;;  %v664_v21 = vadd.f32 %v658_v13, %v485_v18 }
 0x1aa   : > { %v1146_v14 = vpop.f32.mrf.mxu1  ;;  %v662_v5 = vadd.f32 %v587_v19, %v483_v20 }
 0x1ab   : > { %v589_v23 = vpop.f32.mrf.mxu0 }
 0x1ac   : > { %v663_v27 = vadd.f32 %v589_v23, %v484_v22 }
 0x1b8   : > { %v837_v24 = vpop.f32.mrf.mxu1 }
 0x1b9   : > { %v843_v25 = vadd.f32 %v837_v24, %v664_v21  ;;  %v766_v26 = vpop.f32.mrf.mxu0 }
 0x1ba   : > { %v1155_v28 = vpop.f32.mrf.mxu1  ;;  %v841_v30 = vadd.f32 %v766_v26, %v662_v5 }
 0x1bb   : > { %v846_v29 = vmax.f32 %v843_v25, 0.0  ;;  %v768_v31 = vpop.f32.mrf.mxu0 }
 0x1bc   : > { %v842_v33 = vadd.f32 %v768_v31, %v663_v27  ;;  %v844_v35 = vmax.f32 %v841_v30, 0.0 }
 0x1bd   : > { %1157 = vmatpush3.msra.mxu1 %v846_v29 }
 0x1be   : > { %v845_v34 = vmax.f32 %v842_v33, 0.0  ;;  %1159 = vmatmul.mubr.msk.f32.vlgmr.msra.gmra.mxu1 %vm854_vm10, %v847_v32 }
 0x1c0   : > { %888 = vmatprep.subr.mxu0 %v845_v34 }
 0x1c1   : > { %889 = vmatpush1.msra.mxu0 %v844_v35 }
 0x1c2   : > { %1110 = vmatmul.mubr.msk.f32.vlgmr.msra.gmra.mxu0 %vm854_vm10, %v847_v32 }
 0x27e   : > { %v995_v36 = vpop.f32.mrf.mxu1 }
 0x27f   : > { %v996_v38 = vadd.f32 %v995_v36, %v852_v37 }
 0x280   : > { %v1160_v39 = vpop.f32.mrf.mxu1 }
 0x281   : > { %1001 = vst [vmem:[%s282_s30 + $0x10] sm:$0xff] %v996_v38 }
 0x282   : > { %v924_v40 = vpop.f32.mrf.mxu0 }
 0x283   : > { %v925_v41 = vadd.f32 %v924_v40, %v852_v37 }
 0x284   : > { %v926_v42 = vpop.f32.mrf.mxu0 }
 0x285   : > { %v927_v43 = vadd.f32 %v926_v42, %v852_v37  ;;  %999 = vst [vmem:[%s282_s30] sm:$0xff] %v925_v41 }
 0x287   : > { %1000 = vst [vmem:[%s282_s30 + $0x8] sm:$0xff] %v927_v43 }
 0x288   : > { %1304 = shalt.err (!%p1301_p0)
}
 0x289   : > { %s1305_s10 = scalar_lea.hbm %s1015_s8, 384  ;;  %s1309_s2 = scalar_lea.hbm %s1665_s6, 768 }
 0x28a   : > { %p1306_p11 = scmp.ne.s32.totalorder %s1015_s8, %s1305_s10  ;;  %p1310_p1 = scmp.lt.s32.totalorder %s1015_s8, %s1665_s6 }
 0x28b   : > { %p1311_p4 = scmp.lt.s32.totalorder %s1309_s2, %s1305_s10 }
 0x28c   : > { %p1307_p9 = pnand %p1306_p11, %p1683_p3 }
 0x28d   : > { %p1312_p6 = por %p1311_p4, %p1310_p1 }
 0x28e   : > { %p1308_p12 = pneg %p1307_p9 }
 0x290   : > { %p1313_p8 = pnand %p1312_p6, %p1308_p12 }
 0x292   : > { %1316 = shalt.err (!%p1313_p8)
}
 0x293   : > { %1171 = dma.vmem_to_hbm [thread:$0]  (%p1683_p3), %s1018_s12, 384, %s1015_s8, %s1003_s20  }
 0x294 PF: > { %s1029_s30 = sand.u32 1, %s1347_s21   ;;  %p1684_p5 = scmp.ne.s32.totalorder %s1672_s28, 0 }
 0x295   : > { %p1685_p7 = scmp.ge.s32.totalorder %s1359_s24, 2  ;;  %s1030_s11 = scalar_lea.sflag [#allocation4], %s1029_s30 }
 0x297   : > { %p1182_p10 = pnand %p1685_p7, %p1684_p5 }
 0x299   : > { %p1183_p2 = pneg %p1182_p10 }
 0x29b   : > { %1342 = dma.done.wait (%p1183_p2), %s1030_s11, 384  }
 0x29c   : > { %1344 = vsyncadd (%p1183_p2), %s1030_s11, 4294966912  ;;  %p20_p13 = scmp.ge.s32.totalorder %s1466_s9, 4   ;;  %s1686_s21 = smov %s1351_s22 }
 0x29d   : > { %s1687_s22 = smov %s1355_s23  ;;  %s1688_s23 = smov %s1483_s17 }
 0x29e   : > { %s1689_s24 = smov %s1466_s9  ;;  %22 = sbr.rel (!%p20_p13) target bundleno = 8 (0x8), region = 95 }
 0x2a3   :  { %1035 = vsyncpa [#allocation3], 1 }
 0x2a4   :  { %1037 = vsyncpa [#allocation3 + $0x1], 1 }
 0x2a5   :  { %1038 = vsyncpa [#allocation6], 1 }
 0x2a6   :  { %1039 = vsyncpa [#allocation4], 1 }
 0x2a7   :  { %1041 = vsyncpa [#allocation4 + $0x1], 1 }

</bundles_post_ra>
